<compile_context>
chip_gen: v6e
topology: v6e:2x2x1
jax: 0.10.0
libtpu: 0.0.40
codegen_flags: <defaults>
</compile_context>

<pallas_src>
import jax
import jax.numpy as jnp
from jax import lax
from jax.experimental import pallas as pl
from jax.experimental.pallas import tpu as pltpu

EPS = 1e-5
LANE = 128


def encoder_kernel(x_ref, w1_ref, w2_ref, p_ref, o_ref):
    x = x_ref[...]                       # [B,  Dp]
    w1 = w1_ref[...]                     # [Hp, Dp]  (PyTorch [out, in] layout)
    w2 = w2_ref[...]                     # [Hp, Hp]  (PyTorch [out, in] layout)

    # Packed per-feature parameters: one [8, Hp] tile, one DMA.
    g1    = p_ref[0:1, :]                # bn1 gamma
    b1    = p_ref[1:2, :]                # bn1 beta
    g2    = p_ref[2:3, :]                # bn2 gamma
    b2    = p_ref[3:4, :]                # bn2 beta
    bias2 = p_ref[4:5, :]                # fc2 bias

    # fc1: Linear(input_dim, hidden_dim, bias=False)
    # Contract last dims of both operands -> no wrapper-side transpose needed.
    h = lax.dot_general(x, w1, (((1,), (1,)), ((), ())),
                        preferred_element_type=jnp.float32)      # [B, Hp]

    # bn1 (train mode, biased variance), folded into scale/shift.
    mu = jnp.mean(h, axis=0, keepdims=True)
    var = jnp.mean((h - mu) ** 2, axis=0, keepdims=True)
    scale1 = g1 * lax.rsqrt(var + EPS)
    h = h * scale1 + (b1 - mu * scale1)

    # act1: ReLU
    h = jnp.maximum(h, 0.0)

    # fc2: Linear(hidden_dim, hidden_dim) with bias
    h2 = lax.dot_general(h, w2, (((1,), (1,)), ((), ())),
                         preferred_element_type=jnp.float32) + bias2

    # bn2, folded into scale/shift.
    mu2 = jnp.mean(h2, axis=0, keepdims=True)
    var2 = jnp.mean((h2 - mu2) ** 2, axis=0, keepdims=True)
    scale2 = g2 * lax.rsqrt(var2 + EPS)
    o_ref[...] = h2 * scale2 + (b2 - mu2 * scale2)


def _round_up(n, m):
    return ((n + m - 1) // m) * m


def encoder_forward(x, w1, b1_gamma, b1_beta, w2, w2_bias, b2_gamma, b2_beta):
    """x: [B, D_in]; w1: [H, D_in]; w2: [H, H]; bn params / fc2 bias: [H]."""
    B, D = x.shape
    H = w1.shape[0]

    Dp = _round_up(D, LANE)
    Hp = _round_up(H, LANE)

    # Zero-pad feature axes to lane width.  Batch axis is NOT padded (BN stats
    # are taken over the batch, padding it would change the math).
    xp = jnp.pad(x.astype(jnp.float32), ((0, 0), (0, Dp - D)))
    w1p = jnp.pad(w1.astype(jnp.float32), ((0, Hp - H), (0, Dp - D)))
    w2p = jnp.pad(w2.astype(jnp.float32), ((0, Hp - H), (0, Hp - H)))

    # Pack the five per-feature vectors (+ 3 zero rows) into a single [8, Hp]
    # tile: rows = [bn1.g, bn1.b, bn2.g, bn2.b, fc2.bias, 0, 0, 0].
    params = jnp.zeros((8, Hp), jnp.float32)
    params = params.at[0, :H].set(b1_gamma.astype(jnp.float32))
    params = params.at[1, :H].set(b1_beta.astype(jnp.float32))
    params = params.at[2, :H].set(b2_gamma.astype(jnp.float32))
    params = params.at[3, :H].set(b2_beta.astype(jnp.float32))
    params = params.at[4, :H].set(w2_bias.astype(jnp.float32))

    full = lambda shape: pl.BlockSpec(shape, lambda i: (0,) * len(shape))

    out_p = pl.pallas_call(
        encoder_kernel,
        out_shape=jax.ShapeDtypeStruct((B, Hp), jnp.float32),
        grid=(1,),
        in_specs=[
            full((B, Dp)),      # x (padded)
            full((Hp, Dp)),     # fc1 weight [out, in]
            full((Hp, Hp)),     # fc2 weight [out, in]
            full((8, Hp)),      # packed bn1/bn2/bias params
        ],
        out_specs=full((B, Hp)),
        compiler_params=pltpu.CompilerParams(
            dimension_semantics=("arbitrary",)),
    )(xp, w1p, w2p, params)

    # TODO(synk): for large H on v7x, K-tile fc2 over a grid axis with an f32
    # VMEM accumulator and cast MXU inputs to bf16; unnecessary at these sizes.
    return out_p[:, :H]


def encoder_reference(x, w1, b1_gamma, b1_beta, w2, w2_bias, b2_gamma, b2_beta):
    h = x @ w1.T
    mu = h.mean(0, keepdims=True)
    var = ((h - mu) ** 2).mean(0, keepdims=True)
    h = (h - mu) / jnp.sqrt(var + EPS) * b1_gamma + b1_beta
    h = jnp.maximum(h, 0.0)
    h2 = h @ w2.T + w2_bias
    mu2 = h2.mean(0, keepdims=True)
    var2 = ((h2 - mu2) ** 2).mean(0, keepdims=True)
    return (h2 - mu2) / jnp.sqrt(var2 + EPS) * b2_gamma + b2_beta


if __name__ == "__main__":
    B, D_IN, H = 8, 32, 32

    key = jax.random.PRNGKey(0)
    kx, kw1, kw2, kb2 = jax.random.split(key, 4)

    x = jax.random.normal(kx, (B, D_IN), dtype=jnp.float32)

    # Deterministic synthetic parameters (shapes per nn.Linear / nn.BatchNorm1d).
    w1 = jax.random.normal(kw1, (H, D_IN), dtype=jnp.float32) * 0.1   # fc1 weight
    w2 = jax.random.normal(kw2, (H, H), dtype=jnp.float32) * 0.1      # fc2 weight
    w2_bias = jax.random.normal(kb2, (H,), dtype=jnp.float32) * 0.1   # fc2 bias
    b1_gamma = jnp.ones((H,), jnp.float32)                            # bn1 weight
    b1_beta = jnp.zeros((H,), jnp.float32)                            # bn1 bias
    b2_gamma = jnp.ones((H,), jnp.float32)                            # bn2 weight
    b2_beta = jnp.zeros((H,), jnp.float32)                            # bn2 bias

    out = encoder_forward(x, w1, b1_gamma, b1_beta, w2, w2_bias, b2_gamma, b2_beta)
    out = jax.block_until_ready(out)

    ref = encoder_reference(x, w1, b1_gamma, b1_beta, w2, w2_bias, b2_gamma, b2_beta)
    assert out.shape == (B, H)
    assert jnp.allclose(out, ref, atol=1e-4, rtol=1e-4)

    print("KERNEL_OK")
</pallas_src>

<mosaic_0001>
module attributes {stable_mosaic.version = 11 : i64} {
  func.func @encoder_kernel(%arg0: i32, %arg1: memref<8x128xf32, #tpu.memory_space<vmem>>, %arg2: memref<128x128xf32, #tpu.memory_space<vmem>>, %arg3: memref<128x128xf32, #tpu.memory_space<vmem>>, %arg4: memref<8x128xf32, #tpu.memory_space<vmem>>, %arg5: memref<8x128xf32, #tpu.memory_space<vmem>>) attributes {dimension_semantics = [#tpu.dimension_semantics<arbitrary>], iteration_bounds = array<i64: 1>, scalar_prefetch = 0 : i64, scratch_operands = 0 : i64, tpu.core_type = #tpu.core_type<tc>, window_params = [{pipeline_mode = #tpu.pipeline_mode<synchronous>, transform_indices = @transform_0, window_bounds = array<i64: 8, 128>}, {pipeline_mode = #tpu.pipeline_mode<synchronous>, transform_indices = @transform_1, window_bounds = array<i64: 128, 128>}, {pipeline_mode = #tpu.pipeline_mode<synchronous>, transform_indices = @transform_2, window_bounds = array<i64: 128, 128>}, {pipeline_mode = #tpu.pipeline_mode<synchronous>, transform_indices = @transform_3, window_bounds = array<i64: 8, 128>}, {pipeline_mode = #tpu.pipeline_mode<synchronous>, transform_indices = @transform_4, window_bounds = array<i64: 8, 128>}]} {
    %c0 = arith.constant 0 : index
    %c0_0 = arith.constant 0 : index
    %0 = vector.load %arg1[%c0, %c0_0] : memref<8x128xf32, #tpu.memory_space<vmem>>, vector<8x128xf32>
    %c0_1 = arith.constant 0 : index
    %c0_2 = arith.constant 0 : index
    %1 = vector.load %arg2[%c0_1, %c0_2] : memref<128x128xf32, #tpu.memory_space<vmem>>, vector<128x128xf32>
    %c0_3 = arith.constant 0 : index
    %c0_4 = arith.constant 0 : index
    %2 = vector.load %arg3[%c0_3, %c0_4] : memref<128x128xf32, #tpu.memory_space<vmem>>, vector<128x128xf32>
    %c0_5 = arith.constant 0 : index
    %c0_6 = arith.constant 0 : index
    %3 = vector.load %arg4[%c0_5, %c0_6] : memref<8x128xf32, #tpu.memory_space<vmem>>, vector<1x128xf32>
    %c1 = arith.constant 1 : index
    %c0_7 = arith.constant 0 : index
    %4 = vector.load %arg4[%c1, %c0_7] : memref<8x128xf32, #tpu.memory_space<vmem>>, vector<1x128xf32>
    %c2 = arith.constant 2 : index
    %c0_8 = arith.constant 0 : index
    %5 = vector.load %arg4[%c2, %c0_8] : memref<8x128xf32, #tpu.memory_space<vmem>>, vector<1x128xf32>
    %c3 = arith.constant 3 : index
    %c0_9 = arith.constant 0 : index
    %6 = vector.load %arg4[%c3, %c0_9] : memref<8x128xf32, #tpu.memory_space<vmem>>, vector<1x128xf32>
    %c4 = arith.constant 4 : index
    %c0_10 = arith.constant 0 : index
    %7 = vector.load %arg4[%c4, %c0_10] : memref<8x128xf32, #tpu.memory_space<vmem>>, vector<1x128xf32>
    %cst = arith.constant dense<0.000000e+00> : vector<8x128xf32>
    %8 = tpu.matmul %0, %1, %cst {dimension_numbers = #tpu.dot_dimension_numbers<[1], [1], [0], [0], [0, 0, 1, 0], [], []>} : vector<8x128xf32>, vector<128x128xf32>, vector<8x128xf32> -> vector<8x128xf32>
    %cst_11 = arith.constant dense<0.000000e+00> : vector<128xf32>
    %9 = vector.multi_reduction <add>, %8, %cst_11 [0] : vector<8x128xf32> to vector<128xf32>
    %10 = vector.shape_cast %9 : vector<128xf32> to vector<1x128xf32>
    %cst_12 = arith.constant 8.000000e+00 : f32
    %11 = vector.broadcast %cst_12 : f32 to vector<1x128xf32>
    %12 = arith.divf %10, %11 : vector<1x128xf32>
    %13 = vector.broadcast %12 : vector<1x128xf32> to vector<8x128xf32>
    %14 = arith.subf %8, %13 : vector<8x128xf32>
    %15 = arith.mulf %14, %14 : vector<8x128xf32>
    %cst_13 = arith.constant dense<0.000000e+00> : vector<128xf32>
    %16 = vector.multi_reduction <add>, %15, %cst_13 [0] : vector<8x128xf32> to vector<128xf32>
    %17 = vector.shape_cast %16 : vector<128xf32> to vector<1x128xf32>
    %cst_14 = arith.constant 8.000000e+00 : f32
    %18 = vector.broadcast %cst_14 : f32 to vector<1x128xf32>
    %19 = arith.divf %17, %18 : vector<1x128xf32>
    %cst_15 = arith.constant 9.99999974E-6 : f32
    %20 = vector.broadcast %cst_15 : f32 to vector<1x128xf32>
    %21 = arith.addf %19, %20 : vector<1x128xf32>
    %22 = math.rsqrt %21 : vector<1x128xf32>
    %23 = arith.mulf %3, %22 : vector<1x128xf32>
    %24 = vector.broadcast %23 : vector<1x128xf32> to vector<8x128xf32>
    %25 = arith.mulf %8, %24 : vector<8x128xf32>
    %26 = arith.mulf %12, %23 : vector<1x128xf32>
    %27 = arith.subf %4, %26 : vector<1x128xf32>
    %28 = vector.broadcast %27 : vector<1x128xf32> to vector<8x128xf32>
    %29 = arith.addf %25, %28 : vector<8x128xf32>
    %cst_16 = arith.constant 0.000000e+00 : f32
    %30 = vector.broadcast %cst_16 : f32 to vector<8x128xf32>
    %31 = arith.maximumf %29, %30 : vector<8x128xf32>
    %cst_17 = arith.constant dense<0.000000e+00> : vector<8x128xf32>
    %32 = tpu.matmul %31, %2, %cst_17 {dimension_numbers = #tpu.dot_dimension_numbers<[1], [1], [0], [0], [0, 0, 1, 0], [], []>} : vector<8x128xf32>, vector<128x128xf32>, vector<8x128xf32> -> vector<8x128xf32>
    %33 = vector.broadcast %7 : vector<1x128xf32> to vector<8x128xf32>
    %34 = arith.addf %32, %33 : vector<8x128xf32>
    %cst_18 = arith.constant dense<0.000000e+00> : vector<128xf32>
    %35 = vector.multi_reduction <add>, %34, %cst_18 [0] : vector<8x128xf32> to vector<128xf32>
    %36 = vector.shape_cast %35 : vector<128xf32> to vector<1x128xf32>
    %cst_19 = arith.constant 8.000000e+00 : f32
    %37 = vector.broadcast %cst_19 : f32 to vector<1x128xf32>
    %38 = arith.divf %36, %37 : vector<1x128xf32>
    %39 = vector.broadcast %38 : vector<1x128xf32> to vector<8x128xf32>
    %40 = arith.subf %34, %39 : vector<8x128xf32>
    %41 = arith.mulf %40, %40 : vector<8x128xf32>
    %cst_20 = arith.constant dense<0.000000e+00> : vector<128xf32>
    %42 = vector.multi_reduction <add>, %41, %cst_20 [0] : vector<8x128xf32> to vector<128xf32>
    %43 = vector.shape_cast %42 : vector<128xf32> to vector<1x128xf32>
    %cst_21 = arith.constant 8.000000e+00 : f32
    %44 = vector.broadcast %cst_21 : f32 to vector<1x128xf32>
    %45 = arith.divf %43, %44 : vector<1x128xf32>
    %cst_22 = arith.constant 9.99999974E-6 : f32
    %46 = vector.broadcast %cst_22 : f32 to vector<1x128xf32>
    %47 = arith.addf %45, %46 : vector<1x128xf32>
    %48 = math.rsqrt %47 : vector<1x128xf32>
    %49 = arith.mulf %5, %48 : vector<1x128xf32>
    %50 = vector.broadcast %49 : vector<1x128xf32> to vector<8x128xf32>
    %51 = arith.mulf %34, %50 : vector<8x128xf32>
    %52 = arith.mulf %38, %49 : vector<1x128xf32>
    %53 = arith.subf %6, %52 : vector<1x128xf32>
    %54 = vector.broadcast %53 : vector<1x128xf32> to vector<8x128xf32>
    %55 = arith.addf %51, %54 : vector<8x128xf32>
    %c0_23 = arith.constant 0 : index
    %c0_24 = arith.constant 0 : index
    %56 = vector.load %arg5[%c0_23, %c0_24] : memref<8x128xf32, #tpu.memory_space<vmem>>, vector<8x128xf32>
    tpu.vector_store %arg5[%c0_23, %c0_24], %55 {strides = array<i32>} : memref<8x128xf32, #tpu.memory_space<vmem>>, vector<8x128xf32>,
    return
  }
  func.func @transform_0(%arg0: i32) -> (i32, i32) {
    %c0_i32 = arith.constant 0 : i32
    %c0_i32_0 = arith.constant 0 : i32
    %c0_i32_1 = arith.constant 0 : i32
    return %c0_i32, %c0_i32_0 : i32, i32
  }
  func.func @transform_1(%arg0: i32) -> (i32, i32) {
    %c0_i32 = arith.constant 0 : i32
    %c0_i32_0 = arith.constant 0 : i32
    %c0_i32_1 = arith.constant 0 : i32
    return %c0_i32, %c0_i32_0 : i32, i32
  }
  func.func @transform_2(%arg0: i32) -> (i32, i32) {
    %c0_i32 = arith.constant 0 : i32
    %c0_i32_0 = arith.constant 0 : i32
    %c0_i32_1 = arith.constant 0 : i32
    return %c0_i32, %c0_i32_0 : i32, i32
  }
  func.func @transform_3(%arg0: i32) -> (i32, i32) {
    %c0_i32 = arith.constant 0 : i32
    %c0_i32_0 = arith.constant 0 : i32
    %c0_i32_1 = arith.constant 0 : i32
    return %c0_i32, %c0_i32_0 : i32, i32
  }
  func.func @transform_4(%arg0: i32) -> (i32, i32) {
    %c0_i32 = arith.constant 0 : i32
    %c0_i32_0 = arith.constant 0 : i32
    %c0_i32_1 = arith.constant 0 : i32
    return %c0_i32, %c0_i32_0 : i32, i32
  }
}

</mosaic_0001>

<bundles_post_ra>
// kernel: tpu_custom_call.1
= control target key start
LH: loop header
LB: loop body
LE: loop exit
PB: predicated region body
PF: predicated region fallthrough
CT: control target
= control target key end

     0   :  { %9 = vsyncpa [#allocation3], 0  ;;  %s642_s0 = inlined_call_operand.hbm [shape: f32[8,128], index: 0, kind: input, shape index: {}]   ;;  %s643_s1 = inlined_call_operand.hbm [shape: f32[128,128], index: 1, kind: input, shape index: {}]   ;;  %s644_s2 = inlined_call_operand.hbm [shape: f32[128,128], index: 2, kind: input, shape index: {}]   ;;  %s645_s3 = inlined_call_operand.hbm [shape: f32[8,128], index: 3, kind: input, shape index: {}]   ;;  %s646_s4 = inlined_call_operand.hbm [shape: f32[8,128], index: 4, kind: output, shape index: {}]  }
   0x1   :  { %10 = vsyncpa [#allocation6], 0 }
   0x2   :  { %11 = vsyncpa [#allocation9], 0 }
   0x3   :  { %12 = vsyncpa [#allocation4], 0  ;;  %s559_s15 = smov [#allocation5]  }
   0x4   :  { %s28_s16 = sshll.u32 %s559_s15, 4  ;;  %s29_s16 = int_to_ptr.vmem [resolvable:$true] %s28_s16 }
   0x5   :  { %s459_s17 = scalar_lea.vmem %s29_s16, 2048  ;;  %p464_p1 = scmp.lt.s32.totalorder %s29_s16, %s29_s16 }
   0x6   :  { %p460_p0 = scmp.ne.s32.totalorder %s29_s16, %s459_s17  ;;  %p465_p2 = scmp.lt.s32.totalorder %s459_s17, %s459_s17 }
   0x8   :  { %p466_p3 = por %p465_p2, %p464_p1 }
   0xa   :  { %p467_p4 = pnand %p466_p3, %p460_p0 }
   0xc   :  { %470 = shalt.err (!%p467_p4)
}
   0xd   :  { %s560_s18 = smov 128   ;;  %s561_s19 = smov 8  }
   0xe   :  { %34 = dma.hbm_to_vmem [thread:$0]  %s643_s1, 2048, %s29_s16, [#allocation6], %s560_s18, %s560_s18, %s561_s19  }
   0xf   :  { %s562_s22 = smov [#allocation2]   ;;  %s563_s24 = smov [#allocation7]  }
  0x10   :  { %s19_s23 = sshll.u32 %s562_s22, 4  ;;  %s40_s25 = sshll.u32 %s563_s24, 4  ;;  %s20_s23 = int_to_ptr.vmem [resolvable:$true] %s19_s23  ;;  %s41_s25 = int_to_ptr.vmem [resolvable:$true] %s40_s25 }
  0x11   :  { %s479_s26 = scalar_lea.vmem %s20_s23, 128  ;;  %p484_p6 = scmp.lt.s32.totalorder %s20_s23, %s20_s23 }
  0x12   :  { %p480_p5 = scmp.ne.s32.totalorder %s20_s23, %s479_s26  ;;  %p485_p7 = scmp.lt.s32.totalorder %s479_s26, %s479_s26 }
  0x14   :  { %p486_p8 = por %p485_p7, %p484_p6 }
  0x16   :  { %p487_p9 = pnand %p486_p8, %p480_p5 }
  0x18   :  { %490 = shalt.err (!%p487_p9)
}
  0x19   :  { %22 = dma.hbm_to_vmem [thread:$0]  %s642_s0, 128, %s20_s23, [#allocation3]  }
  0x1a   :  { %s499_s29 = scalar_lea.vmem %s41_s25, 2048  ;;  %p504_p11 = scmp.lt.s32.totalorder %s41_s25, %s41_s25 }
  0x1b   :  { %p500_p10 = scmp.ne.s32.totalorder %s41_s25, %s499_s29  ;;  %p505_p12 = scmp.lt.s32.totalorder %s499_s29, %s499_s29 }
  0x1d   :  { %p506_p13 = por %p505_p12, %p504_p11 }
  0x1f   :  { %p507_p0 = pnand %p506_p13, %p500_p10 }
  0x21   :  { %510 = shalt.err (!%p507_p0)
}
  0x22   :  { %46 = dma.hbm_to_vmem [thread:$0]  %s644_s2, 2048, %s41_s25, [#allocation6], %s560_s18, %s560_s18, %s561_s19  }
  0x23   :  { %s564_s5 = smov [#allocation8]  }
  0x24   :  { %s53_s6 = sshll.u32 %s564_s5, 4  ;;  %s54_s6 = int_to_ptr.vmem [resolvable:$true] %s53_s6 }
  0x25   :  { %s519_s7 = scalar_lea.vmem %s54_s6, 128  ;;  %p524_p2 = scmp.lt.s32.totalorder %s54_s6, %s54_s6 }
  0x26   :  { %p520_p1 = scmp.ne.s32.totalorder %s54_s6, %s519_s7  ;;  %p525_p3 = scmp.lt.s32.totalorder %s519_s7, %s519_s7 }
  0x28   :  { %p526_p4 = por %p525_p3, %p524_p2 }
  0x2a   :  { %p527_p5 = pnand %p526_p4, %p520_p1 }
  0x2c   :  { %530 = shalt.err (!%p527_p5)
}
  0x2d   :  { %56 = dma.hbm_to_vmem [thread:$0]  %s645_s3, 128, %s54_s6, [#allocation9]  }
  0x2e   :  { %551 = dma.done.wait [#allocation3], 128  }
  0x2f   :  { %552 = vsyncadd [#allocation3], 4294967168 }
  0x30   :  { %553 = dma.done.wait [#allocation6], 4096  }
  0x31   :  { %554 = vsyncadd [#allocation6], 4294963200 }
  0x32   :  { %555 = dma.done.wait [#allocation9], 128  }
  0x33   :  { %556 = vsyncadd [#allocation9], 4294967168  ;;  %v565_v0 = vmov 0.0   ;;  %vm566_vm0 = vmmov 0   ;;  %v85_v1 = vld [vmem:[#allocation5 + $0x78] sm:$0xff]  ;;  %v84_v2 = vld [vmem:[#allocation5 + $0x70] sm:$0xff]  ;;  %v197_v53 = vlaneseq }
  0x34   :  { %368 = vmatprep.subr.mxu0 %v565_v0  ;;  %400 = vmatprep.mubr.msk.f32.mxu0 %vm566_vm0, %v565_v0  ;;  %v101_v3 = vld [vmem:[#allocation7 + $0x78] sm:$0xff]  ;;  %v83_v4 = vld [vmem:[#allocation5 + $0x68] sm:$0xff]  ;;  %v82_v5 = vld [vmem:[#allocation5 + $0x60] sm:$0xff]  ;;  %s567_s2 = smov [#allocation10]  }
  0x35   :  { %403 = vmatprep.subr.mxu1 %v565_v0  ;;  %435 = vmatprep.mubr.msk.f32.mxu1 %vm566_vm0, %v565_v0  ;;  %v81_v6 = vld [vmem:[#allocation5 + $0x58] sm:$0xff]  ;;  %v80_v7 = vld [vmem:[#allocation5 + $0x50] sm:$0xff]  ;;  %v79_v8 = vld [vmem:[#allocation5 + $0x48] sm:$0xff]  ;;  %v198_v54 = vshrl.u32 %v197_v53, 7  ;;  %s322_s3 = sshll.u32 %s567_s2, 4  ;;  %s323_s3 = int_to_ptr.vmem [resolvable:$true] %s322_s3 }
  0x36   :  { %369 = vmatpush3.xpose.msra.mxu0 %v85_v1  ;;  %404 = vmatpush3.xpose.msra.mxu1 %v101_v3  ;;  %v78_v9 = vld [vmem:[#allocation5 + $0x40] sm:$0xff]  ;;  %v77_v10 = vld [vmem:[#allocation5 + $0x38] sm:$0xff]  ;;  %v76_v11 = vld [vmem:[#allocation5 + $0x30] sm:$0xff]  ;;  %s531_s9 = scalar_lea.vmem %s323_s3, 128  ;;  %p536_p7 = scmp.lt.s32.totalorder %s323_s3, %s323_s3 }
  0x37   :  { %370 = vmatprep.subr.mxu0 %v565_v0  ;;  %405 = vmatprep.subr.mxu1 %v565_v0  ;;  %v75_v12 = vld [vmem:[#allocation5 + $0x28] sm:$0xff]  ;;  %v74_v13 = vld [vmem:[#allocation5 + $0x20] sm:$0xff]  ;;  %v73_v14 = vld [vmem:[#allocation5 + $0x18] sm:$0xff]  ;;  %v199_v56 = vsub.s32 0, %v198_v54  ;;  %p532_p6 = scmp.ne.s32.totalorder %s323_s3, %s531_s9  ;;  %p537_p8 = scmp.lt.s32.totalorder %s531_s9, %s531_s9 }
  0x38   :  { %v72_v15 = vld [vmem:[#allocation5 + $0x10] sm:$0xff]  ;;  %v71_v16 = vld [vmem:[#allocation5 + $0x8] sm:$0xff]  ;;  %v70_v17 = vld [vmem:[#allocation5] sm:$0xff] }
  0x39   :  { %v69_v18 = vld [vmem:[#allocation2] sm:$0xff]  ;;  %v100_v19 = vld [vmem:[#allocation7 + $0x70] sm:$0xff]  ;;  %v99_v20 = vld [vmem:[#allocation7 + $0x68] sm:$0xff]  ;;  %p538_p9 = por %p537_p8, %p536_p7 }
  0x3a   :  { %371 = vmatpush3.xpose.msra.mxu0 %v84_v2  ;;  %406 = vmatpush3.xpose.msra.mxu1 %v100_v19  ;;  %v98_v21 = vld [vmem:[#allocation7 + $0x60] sm:$0xff]  ;;  %v97_v22 = vld [vmem:[#allocation7 + $0x58] sm:$0xff]  ;;  %v96_v23 = vld [vmem:[#allocation7 + $0x50] sm:$0xff] }
  0x3b   :  { %372 = vmatprep.subr.mxu0 %v565_v0  ;;  %407 = vmatprep.subr.mxu1 %v565_v0  ;;  %v95_v24 = vld [vmem:[#allocation7 + $0x48] sm:$0xff]  ;;  %v94_v25 = vld [vmem:[#allocation7 + $0x40] sm:$0xff]  ;;  %v93_v26 = vld [vmem:[#allocation7 + $0x38] sm:$0xff]  ;;  %p539_p10 = pnand %p538_p9, %p532_p6 }
  0x3c   :  { %v92_v27 = vld [vmem:[#allocation7 + $0x30] sm:$0xff]  ;;  %v91_v28 = vld [vmem:[#allocation7 + $0x28] sm:$0xff]  ;;  %v90_v29 = vld [vmem:[#allocation7 + $0x20] sm:$0xff] }
  0x3d   :  { %v89_v30 = vld [vmem:[#allocation7 + $0x18] sm:$0xff]  ;;  %v88_v31 = vld [vmem:[#allocation7 + $0x10] sm:$0xff]  ;;  %v87_v32 = vld [vmem:[#allocation7 + $0x8] sm:$0xff] }
  0x3e   :  { %373 = vmatpush3.xpose.msra.mxu0 %v83_v4  ;;  %408 = vmatpush3.xpose.msra.mxu1 %v99_v20  ;;  %v86_v33 = vld [vmem:[#allocation7] sm:$0xff] }
  0x3f   :  { %374 = vmatprep.subr.mxu0 %v565_v0  ;;  %409 = vmatprep.subr.mxu1 %v565_v0  ;;  %v102_v55 = vld [vmem:[#allocation8] sm:$0x1]  ;;  %v103_v59 = vld [vmem:[#allocation8 + $0x1] sm:$0x1]  ;;  %v333_v3 = vld [vmem:[#allocation8 + $0x4] ss:$0 sm:$0xff] }
  0x42   :  { %375 = vmatpush3.xpose.msra.mxu0 %v82_v5  ;;  %410 = vmatpush3.xpose.msra.mxu1 %v98_v21 }
  0x43   :  { %376 = vmatprep.subr.mxu0 %v565_v0  ;;  %411 = vmatprep.subr.mxu1 %v565_v0 }
  0x46   :  { %377 = vmatpush3.xpose.msra.mxu0 %v81_v6  ;;  %412 = vmatpush3.xpose.msra.mxu1 %v97_v22 }
  0x47   :  { %378 = vmatprep.subr.mxu0 %v565_v0  ;;  %413 = vmatprep.subr.mxu1 %v565_v0 }
  0x4a   :  { %379 = vmatpush3.xpose.msra.mxu0 %v80_v7  ;;  %414 = vmatpush3.xpose.msra.mxu1 %v96_v23 }
  0x4b   :  { %380 = vmatprep.subr.mxu0 %v565_v0  ;;  %415 = vmatprep.subr.mxu1 %v565_v0 }
  0x4e   :  { %381 = vmatpush3.xpose.msra.mxu0 %v79_v8  ;;  %416 = vmatpush3.xpose.msra.mxu1 %v95_v24  ;;  %v104_v24 = vld [vmem:[#allocation8 + $0x2] sm:$0x1] }
  0x4f   :  { %382 = vmatprep.subr.mxu0 %v565_v0  ;;  %417 = vmatprep.subr.mxu1 %v565_v0 }
  0x52   :  { %383 = vmatpush3.xpose.msra.mxu0 %v78_v9  ;;  %418 = vmatpush3.xpose.msra.mxu1 %v94_v25 }
  0x53   :  { %384 = vmatprep.subr.mxu0 %v565_v0  ;;  %419 = vmatprep.subr.mxu1 %v565_v0 }
  0x56   :  { %385 = vmatpush3.xpose.msra.mxu0 %v77_v10  ;;  %420 = vmatpush3.xpose.msra.mxu1 %v93_v26 }
  0x57   :  { %386 = vmatprep.subr.mxu0 %v565_v0  ;;  %421 = vmatprep.subr.mxu1 %v565_v0 }
  0x5a   :  { %387 = vmatpush3.xpose.msra.mxu0 %v76_v11  ;;  %422 = vmatpush3.xpose.msra.mxu1 %v92_v27  ;;  %v105_v27 = vld [vmem:[#allocation8 + $0x3] sm:$0x1] }
  0x5b   :  { %388 = vmatprep.subr.mxu0 %v565_v0  ;;  %423 = vmatprep.subr.mxu1 %v565_v0 }
  0x5e   :  { %389 = vmatpush3.xpose.msra.mxu0 %v75_v12  ;;  %424 = vmatpush3.xpose.msra.mxu1 %v91_v28 }
  0x5f   :  { %390 = vmatprep.subr.mxu0 %v565_v0  ;;  %425 = vmatprep.subr.mxu1 %v565_v0 }
  0x62   :  { %391 = vmatpush3.xpose.msra.mxu0 %v74_v13  ;;  %426 = vmatpush3.xpose.msra.mxu1 %v90_v29 }
  0x63   :  { %392 = vmatprep.subr.mxu0 %v565_v0  ;;  %427 = vmatprep.subr.mxu1 %v565_v0 }
  0x66   :  { %393 = vmatpush3.xpose.msra.mxu0 %v73_v14  ;;  %428 = vmatpush3.xpose.msra.mxu1 %v89_v30 }
  0x67   :  { %394 = vmatprep.subr.mxu0 %v565_v0  ;;  %429 = vmatprep.subr.mxu1 %v565_v0 }
  0x6a   :  { %395 = vmatpush3.xpose.msra.mxu0 %v72_v15  ;;  %430 = vmatpush3.xpose.msra.mxu1 %v88_v31 }
  0x6b   :  { %396 = vmatprep.subr.mxu0 %v565_v0  ;;  %431 = vmatprep.subr.mxu1 %v565_v0 }
  0x6e   :  { %397 = vmatpush3.xpose.msra.mxu0 %v71_v16  ;;  %432 = vmatpush3.xpose.msra.mxu1 %v87_v32 }
  0x6f   :  { %398 = vmatprep.subr.mxu0 %v565_v0  ;;  %433 = vmatprep.subr.mxu1 %v565_v0 }
  0x72   :  { %399 = vmatpush3.xpose.msra.mxu0 %v70_v17  ;;  %434 = vmatpush3.xpose.msra.mxu1 %v86_v33 }
  0x75   :  { %401 = vmatmul.mubr.f32.vlgmr.msra.gmra.mxu0 %v69_v18 }
 0x135   :  { %v173_v34 = vpop.f32.mrf.mxu0 }
 0x136   :  { %v177_v35 = vrot.slane %v173_v34, 4 }
 0x137   :  { %v402_v36 = vpop.f32.mrf.mxu0 }
 0x138   :  { %v178_v37 = vadd.f32 %v177_v35, %v173_v34 }
 0x13a   :  { %v179_v38 = vrot.slane %v178_v37, 2 }
 0x13c   :  { %v180_v39 = vadd.f32 %v179_v38, %v178_v37 }
 0x13e   :  { %v181_v40 = vrot.slane %v180_v39, 1 }
 0x140   :  { %v182_v41 = vadd.f32 %v181_v40, %v180_v39 }
 0x142   :  { %v184_v42 = vmul.f32 0.125, %v182_v41 }
 0x144   :  { %v185_v43 = vsub.f32 %v173_v34, %v184_v42 }
 0x146   :  { %v186_v44 = vmul.f32 %v185_v43, %v185_v43 }
 0x148   :  { %v187_v45 = vrot.slane %v186_v44, 4 }
 0x14a   :  { %v188_v46 = vadd.f32 %v187_v45, %v186_v44 }
 0x14c   :  { %v189_v47 = vrot.slane %v188_v46, 2 }
 0x14e   :  { %v190_v48 = vadd.f32 %v189_v47, %v188_v46 }
 0x150   :  { %v191_v49 = vrot.slane %v190_v48, 1 }
 0x152   :  { %v192_v50 = vadd.f32 %v191_v49, %v190_v48 }
 0x154   :  { %v193_v51 = vmul.f32 0.125, %v192_v50 }
 0x156   :  { %v194_v52 = vadd.f32 1e-05, %v193_v51 }
 0x158   :  { %447 = vrsqrt.f32 %v194_v52 }
 0x165   :  { %v448_v57 = vpop.eup %447 }
 0x166   :  { %v196_v58 = vmul.f32 %v448_v57, %v102_v55 }
 0x168   :  { %v200_v60 = vrot.slane %v196_v58, %v199_v56  ;;  %v202_v61 = vmul.f32 %v196_v58, %v184_v42 }
 0x16a   :  { %v203_v62 = vsub.f32 %v103_v59, %v202_v61  ;;  %v201_v63 = vmul.f32 %v200_v60, %v173_v34 }
 0x16c   :  { %v207_v0 = vrot.slane %v203_v62, %v199_v56 }
 0x16e   :  { %v208_v1 = vadd.f32 %v207_v0, %v201_v63 }
 0x170   :  { %v209_v2 = vmax.f32 %v208_v1, 0.0 }
 0x172   :  { %436 = vmatmul.mubr.f32.vlgmr.msra.gmra.mxu1 %v209_v2 }
 0x232   :  { %v280_v4 = vpop.f32.mrf.mxu1 }
 0x233   :  { %v281_v5 = vadd.f32 %v333_v3, %v280_v4 }
 0x234   :  { %v437_v6 = vpop.f32.mrf.mxu1 }
 0x235   :  { %v284_v7 = vrot.slane %v281_v5, 4 }
 0x237   :  { %v285_v8 = vadd.f32 %v284_v7, %v281_v5 }
 0x239   :  { %v286_v9 = vrot.slane %v285_v8, 2 }
 0x23b   :  { %v287_v10 = vadd.f32 %v286_v9, %v285_v8 }
 0x23d   :  { %v288_v11 = vrot.slane %v287_v10, 1 }
 0x23f   :  { %v289_v12 = vadd.f32 %v288_v11, %v287_v10 }
 0x241   :  { %v290_v13 = vmul.f32 0.125, %v289_v12 }
 0x243   :  { %v291_v14 = vsub.f32 %v281_v5, %v290_v13 }
 0x245   :  { %v292_v15 = vmul.f32 %v291_v14, %v291_v14 }
 0x247   :  { %v293_v16 = vrot.slane %v292_v15, 4 }
 0x249   :  { %v294_v17 = vadd.f32 %v293_v16, %v292_v15 }
 0x24b   :  { %v295_v18 = vrot.slane %v294_v17, 2 }
 0x24d   :  { %v296_v19 = vadd.f32 %v295_v18, %v294_v17 }
 0x24f   :  { %v297_v20 = vrot.slane %v296_v19, 1 }
 0x251   :  { %v298_v21 = vadd.f32 %v297_v20, %v296_v19 }
 0x253   :  { %v299_v22 = vmul.f32 0.125, %v298_v21 }
 0x255   :  { %v300_v23 = vadd.f32 1e-05, %v299_v22 }
 0x257   :  { %449 = vrsqrt.f32 %v300_v23 }
 0x264   :  { %v450_v25 = vpop.eup %449 }
 0x265   :  { %v302_v26 = vmul.f32 %v450_v25, %v104_v24 }
 0x267   :  { %v306_v28 = vrot.slane %v302_v26, %v199_v56  ;;  %v308_v29 = vmul.f32 %v302_v26, %v290_v13 }
 0x269   :  { %v309_v30 = vsub.f32 %v105_v27, %v308_v29  ;;  %v307_v31 = vmul.f32 %v306_v28, %v281_v5 }
 0x26b   :  { %v313_v32 = vrot.slane %v309_v30, %v199_v56 }
 0x26d   :  { %v314_v33 = vadd.f32 %v313_v32, %v307_v31 }
 0x26f   :  { %315 = vst [vmem:[#allocation10] sm:$0xff] %v314_v33 }
 0x270   :  { %542 = shalt.err (!%p539_p10)
}
 0x271   :  { %325 = dma.vmem_to_hbm [thread:$0]  %s323_s3, 128, %s646_s4, [#allocation4]  }
 0x272   :  { %557 = dma.done.wait [#allocation4], 128  }
 0x273   :  { %558 = vsyncadd [#allocation4], 4294967168 }
 0x274   :  { %329 = vsyncpa [#allocation3], 1 }
 0x275   :  { %330 = vsyncpa [#allocation6], 1 }
 0x276   :  { %331 = vsyncpa [#allocation9], 1 }
 0x277   :  { %332 = vsyncpa [#allocation4], 1 }

</bundles_post_ra>
